<compile_context>
chip_gen: v7x
topology: tpu7x:2x2x1
jax: 0.10.0
libtpu: 0.0.40
codegen_flags: <defaults>
</compile_context>

<pallas_src>
import functools

import jax
import jax.numpy as jnp
from jax.experimental import pallas as pl
from jax.experimental.pallas import tpu as pltpu


def _round_up(x: int, m: int) -> int:
    return (x + m - 1) // m * m


def _layer_norm_kernel(params_ref, x_ref, o_ref, *, eps: float):
    """params_ref: SMEM (2,) f32 = [alpha, bias]; x_ref/o_ref: (tm, D) VMEM tiles."""
    x = x_ref[...].astype(jnp.float32)                       # compute in f32
    d = x.shape[-1]

    mean = jnp.sum(x, axis=-1, keepdims=True) * (1.0 / d)
    diff = x - mean
    # torch.std uses Bessel's correction (divide by D-1).
    denom = max(d - 1, 1)
    var = jnp.sum(diff * diff, axis=-1, keepdims=True) * (1.0 / denom)
    std = jnp.sqrt(var)

    alpha = params_ref[0]
    bias = params_ref[1]
    y = alpha * diff / (std + eps) + bias
    o_ref[...] = y.astype(o_ref.dtype)


def layer_norm_forward(x, alpha, bias, eps: float = 1e-6,
                       target_block_bytes: int = 2 * 1024 * 1024):
    """LayerNormalization forward. x: (..., D); alpha, bias: scalar params (shape (1,))."""
    orig_shape = x.shape
    D = int(orig_shape[-1])
    x2 = x.reshape(-1, D)
    R = int(x2.shape[0])

    # Row tile: ~target_block_bytes of f32 per block, row count a multiple of 8
    # sublanes (or the full padded extent for tiny inputs).
    tm = (target_block_bytes // (4 * D)) // 8 * 8
    tm = int(min(max(tm, 8), _round_up(R, 8)))
    R_pad = _round_up(R, tm)
    if R_pad != R:
        x2 = jnp.pad(x2, ((0, R_pad - R), (0, 0)))  # padded rows are sliced off below

    params = jnp.concatenate([
        jnp.asarray(alpha, jnp.float32).reshape(1),
        jnp.asarray(bias, jnp.float32).reshape(1),
    ])

    out = pl.pallas_call(
        functools.partial(_layer_norm_kernel, eps=float(eps)),
        out_shape=jax.ShapeDtypeStruct((R_pad, D), x.dtype),
        grid=(R_pad // tm,),
        in_specs=[
            pl.BlockSpec(memory_space=pltpu.MemorySpace.SMEM),   # [alpha, bias]
            pl.BlockSpec((tm, D), lambda i: (i, 0)),             # x row-tile
        ],
        out_specs=pl.BlockSpec((tm, D), lambda i: (i, 0)),
        compiler_params=pltpu.CompilerParams(
            dimension_semantics=("parallel",),       # rows are independent
            vmem_limit_bytes=32 * 1024 * 1024,
        ),
    )(params, x2)

    if R_pad != R:
        out = out[:R]
    return out.reshape(orig_shape)


if __name__ == "__main__":
    batch, seq, hidden = 2, 8, 32
    eps = 1e-6

    key = jax.random.PRNGKey(0)
    x = jax.random.normal(key, (batch, seq, hidden), dtype=jnp.float32)

    # Module init: alpha = ones(1), bias = zeros(1)
    alpha = jnp.ones((1,), dtype=jnp.float32)
    bias = jnp.zeros((1,), dtype=jnp.float32)

    out = layer_norm_forward(x, alpha, bias, eps=eps)
    out = jax.block_until_ready(out)

    # Pure-JAX reference matching the PyTorch module (torch.std is unbiased).
    mean = jnp.mean(x, axis=-1, keepdims=True)
    std = jnp.std(x, axis=-1, keepdims=True, ddof=1)
    ref = alpha[0] * (x - mean) / (std + eps) + bias[0]

    assert out.shape == x.shape and out.dtype == x.dtype
    assert jnp.allclose(out, ref, atol=1e-5, rtol=1e-5), "layer-norm mismatch"

    # Exercise non-default learnable parameters too.
    out2 = layer_norm_forward(x, jnp.full((1,), 1.5, jnp.float32),
                              jnp.full((1,), -0.25, jnp.float32), eps=eps)
    out2 = jax.block_until_ready(out2)
    ref2 = 1.5 * (x - mean) / (std + eps) - 0.25
    assert jnp.allclose(out2, ref2, atol=1e-5, rtol=1e-5), "param mismatch"

    print("KERNEL_OK")
</pallas_src>

<mosaic_0001>
module attributes {stable_mosaic.version = 11 : i64} {
  func.func @_layer_norm_kernel(%arg0: i32, %arg1: memref<2xf32, #tpu.memory_space<smem>>, %arg2: memref<16x32xf32, #tpu.memory_space<vmem>>, %arg3: memref<16x32xf32, #tpu.memory_space<vmem>>) attributes {dimension_semantics = [#tpu.dimension_semantics<parallel>], iteration_bounds = array<i64: 1>, scalar_prefetch = 0 : i64, scratch_operands = 0 : i64, tpu.core_type = #tpu.core_type<tc>, window_params = [{transform_indices = @transform_0, window_bounds = array<i64: 2>}, {transform_indices = @transform_1, window_bounds = array<i64: 16, 32>}, {transform_indices = @transform_2, window_bounds = array<i64: 16, 32>}]} {
    %c0 = arith.constant 0 : index
    %c0_0 = arith.constant 0 : index
    %0 = vector.load %arg2[%c0, %c0_0] : memref<16x32xf32, #tpu.memory_space<vmem>>, vector<16x32xf32>
    %cst = arith.constant dense<0.000000e+00> : vector<16xf32>
    %1 = vector.multi_reduction <add>, %0, %cst [1] : vector<16x32xf32> to vector<16xf32>
    %2 = vector.shape_cast %1 : vector<16xf32> to vector<16x1xf32>
    %cst_1 = arith.constant 3.125000e-02 : f32
    %3 = vector.broadcast %cst_1 : f32 to vector<16x1xf32>
    %4 = arith.mulf %2, %3 : vector<16x1xf32>
    %5 = vector.broadcast %4 : vector<16x1xf32> to vector<16x32xf32>
    %6 = arith.subf %0, %5 : vector<16x32xf32>
    %7 = arith.mulf %6, %6 : vector<16x32xf32>
    %cst_2 = arith.constant dense<0.000000e+00> : vector<16xf32>
    %8 = vector.multi_reduction <add>, %7, %cst_2 [1] : vector<16x32xf32> to vector<16xf32>
    %9 = vector.shape_cast %8 : vector<16xf32> to vector<16x1xf32>
    %cst_3 = arith.constant 0.0322580636 : f32
    %10 = vector.broadcast %cst_3 : f32 to vector<16x1xf32>
    %11 = arith.mulf %9, %10 : vector<16x1xf32>
    %12 = math.sqrt %11 : vector<16x1xf32>
    %c0_4 = arith.constant 0 : index
    %13 = memref.load %arg1[%c0_4] : memref<2xf32, #tpu.memory_space<smem>>
    %c1 = arith.constant 1 : index
    %14 = memref.load %arg1[%c1] : memref<2xf32, #tpu.memory_space<smem>>
    %15 = vector.broadcast %13 : f32 to vector<16x32xf32>
    %16 = arith.mulf %15, %6 : vector<16x32xf32>
    %cst_5 = arith.constant 9.99999997E-7 : f32
    %17 = vector.broadcast %cst_5 : f32 to vector<16x1xf32>
    %18 = arith.addf %12, %17 : vector<16x1xf32>
    %19 = vector.broadcast %18 : vector<16x1xf32> to vector<16x32xf32>
    %20 = arith.divf %16, %19 : vector<16x32xf32>
    %21 = vector.broadcast %14 : f32 to vector<16x32xf32>
    %22 = arith.addf %20, %21 : vector<16x32xf32>
    %c0_6 = arith.constant 0 : index
    %c0_7 = arith.constant 0 : index
    %23 = vector.load %arg3[%c0_6, %c0_7] : memref<16x32xf32, #tpu.memory_space<vmem>>, vector<16x32xf32>
    tpu.vector_store %arg3[%c0_6, %c0_7], %22 {strides = array<i32>} : memref<16x32xf32, #tpu.memory_space<vmem>>, vector<16x32xf32>,
    return
  }
  func.func @transform_0(%arg0: i32) -> i32 {
    %c0_i32 = arith.constant 0 : i32
    %c0_i32_0 = arith.constant 0 : i32
    return %c0_i32 : i32
  }
  func.func @transform_1(%arg0: i32) -> (i32, i32) {
    %c0_i32 = arith.constant 0 : i32
    %c0_i32_0 = arith.constant 0 : i32
    return %arg0, %c0_i32 : i32, i32
  }
  func.func @transform_2(%arg0: i32) -> (i32, i32) {
    %c0_i32 = arith.constant 0 : i32
    %c0_i32_0 = arith.constant 0 : i32
    return %arg0, %c0_i32 : i32, i32
  }
}

</mosaic_0001>

<bundles_post_ra>
// kernel: tpu_custom_call.1
= control target key start
LH: loop header
LB: loop body
LE: loop exit
PB: predicated region body
PF: predicated region fallthrough
CT: control target
= control target key end

     0   :  { %7 = vsyncpa [#allocation5], 0  ;;  %s250_s0 = inlined_call_operand.hbm [shape: f32[2], index: 0, kind: input, shape index: {}]   ;;  %s251_s1 = inlined_call_operand.hbm [shape: f32[16,32], index: 1, kind: input, shape index: {}]   ;;  %s252_s2 = inlined_call_operand.hbm [shape: f32[16,32], index: 2, kind: output, shape index: {}]  }
   0x1   :  { %8 = vsyncpa [#allocation3], 0 }
   0x2   :  { %9 = vsyncpa [#allocation4], 0  ;;  %s122_s11 = scalar_lea.hbm %s250_s0, 16 }
   0x3   :  { %p123_p0 = scmp.ne.s32.totalorder %s250_s0, %s122_s11  ;;  %p126_p1 = scmp.lt.u32.totalorder %s122_s11, %s250_s0 }
   0x5   :  { %p128_p2 = pnand %p126_p1, %p123_p0 }
   0x7   :  { %131 = shalt.err (!%p128_p2)
}
   0x8   :  { %s182_s16 = smov [#allocation2]   ;;  %s183_s19 = smov [#allocation6]  }
   0x9   :  { %17 = dma.hbm_to_smem %s250_s0, 16, %s182_s16, [#allocation5]  }
   0xa   :  { %s23_s20 = sshll.u32 %s183_s19, 4  ;;  %s132_s23 = scalar_lea.hbm %s251_s1, 256  ;;  %s24_s20 = int_to_ptr.vmem [resolvable:$true] %s23_s20 }
   0xb   :  { %p133_p3 = scmp.ne.s32.totalorder %s251_s1, %s132_s23  ;;  %p136_p4 = scmp.lt.u32.totalorder %s132_s23, %s251_s1 }
   0xd   :  { %p138_p5 = pnand %p136_p4, %p133_p3 }
   0xf   :  { %141 = shalt.err (!%p138_p5)
}
  0x10   :  { %s142_s28 = scalar_lea.vmem %s24_s20, 256  ;;  %p147_p7 = scmp.lt.s32.totalorder %s24_s20, %s24_s20 }
  0x11   :  { %p143_p6 = scmp.ne.s32.totalorder %s24_s20, %s142_s28  ;;  %p148_p8 = scmp.lt.s32.totalorder %s142_s28, %s142_s28 }
  0x13   :  { %p149_p9 = por %p148_p8, %p147_p7 }
  0x15   :  { %p150_p10 = pnand %p149_p9, %p143_p6 }
  0x17   :  { %153 = shalt.err (!%p150_p10)
}
  0x18   :  { %s184_s0 = smov 128   ;;  %s185_s29 = smov 8  }
  0x19   :  { %29 = dma.hbm_to_vmem [thread:$0]  %s251_s1, 256, %s24_s20, [#allocation3], %s184_s0, %s184_s0, %s185_s29  }
  0x1a   :  { %176 = dma.done.wait [#allocation5], 16  }
  0x1b   :  { %177 = vsyncadd [#allocation5], 4294967280 }
  0x1c   :  { %178 = dma.done.wait [#allocation3], 256  }
  0x1d   :  { %179 = vsyncadd [#allocation3], 4294967040 }
  0x1e   :  { %36 = sfence }
  0x1f   :  { %v37_v0 = vld [vmem:[#allocation6] sm:$0xff]  ;;  %vm39_vm0 = vcmask 261120   ;;  %v38_v1 = vld [vmem:[#allocation6 + $0x8] sm:$0xff]  ;;  %s74_s1 = sld [smem:[#allocation2]]  ;;  %s108_s4 = sld [smem:[#allocation2 + $0x1]] }
  0x20   :  { %v40_v2 = vsel %vm39_vm0, %v37_v0, 0.0  ;;  %v43_v3 = vsel %vm39_vm0, %v38_v1, 0.0  ;;  %s186_s5 = smov [#allocation7]  }
  0x21   :  { %41 = vadd.xlane.f32.xlu0 %v40_v2  ;;  %s95_s6 = sshll.u32 %s186_s5, 4  ;;  %s96_s6 = int_to_ptr.vmem [resolvable:$true] %s95_s6 }
  0x22   :  { %s154_s7 = scalar_lea.vmem %s96_s6, 256  ;;  %p159_p12 = scmp.lt.s32.totalorder %s96_s6, %s96_s6 }
  0x23   :  { %p155_p11 = scmp.ne.s32.totalorder %s96_s6, %s154_s7  ;;  %p160_p13 = scmp.lt.s32.totalorder %s154_s7, %s154_s7 }
  0x25   :  { %44 = vadd.xlane.f32.xlu0 %v43_v3  ;;  %v76_v30 = vstv %s74_s1  ;;  %v85_v33 = vstv %s108_s4  ;;  %p161_p0 = por %p160_p13, %p159_p12 }
  0x27   :  { %p162_p1 = pnand %p161_p0, %p155_p11 }
  0xae   :  { %v42_v4 = vpop.xlane.xlu0 %41 }
  0xaf   :  { %v46_v5 = vmul.f32 0.03125, %v42_v4 }
  0xb1   :  { %v48_v6 = vsub.f32 %v37_v0, %v46_v5 }
  0xb2   :  { %v45_v7 = vpop.xlane.xlu0 %44 }
  0xb3   :  { %v47_v8 = vmul.f32 0.03125, %v45_v7  ;;  %v50_v9 = vmul.f32 %v48_v6, %v48_v6  ;;  %v77_v31 = vmul.f32 %v76_v30, %v48_v6 }
  0xb5   :  { %v49_v10 = vsub.f32 %v38_v1, %v47_v8  ;;  %v52_v11 = vsel %vm39_vm0, %v50_v9, 0.0 }
  0xb6   :  { %53 = vadd.xlane.f32.xlu1 %v52_v11 }
  0xb7   :  { %v51_v12 = vmul.f32 %v49_v10, %v49_v10  ;;  %v78_v35 = vmul.f32 %v76_v30, %v49_v10 }
  0xb9   :  { %v55_v13 = vsel %vm39_vm0, %v51_v12, 0.0 }
  0xba   :  { %56 = vadd.xlane.f32.xlu1 %v55_v13 }
 0x143   :  { %v54_v14 = vpop.xlane.xlu1 %53 }
 0x144   :  { %v58_v15 = vmul.f32 0.032258064, %v54_v14 }
 0x146   :  { %114 = vrsqrt.f32 %v58_v15  ;;  %vm62_vm1 = vcmp.eq.f32.partialorder %v58_v15, inf  ;;  %v65_v20 = vand.u32 2147483648, %v58_v15  ;;  %vm64_vm2 = vcmp.eq.f32.partialorder %v58_v15, 0.0 }
 0x147   :  { %v57_v16 = vpop.xlane.xlu1 %56 }
 0x148   :  { %v59_v17 = vmul.f32 0.032258064, %v57_v16 }
 0x14a   :  { %116 = vrsqrt.f32 %v59_v17  ;;  %vm69_vm3 = vcmp.eq.f32.partialorder %v59_v17, inf  ;;  %v72_v26 = vand.u32 2147483648, %v59_v17  ;;  %vm71_vm4 = vcmp.eq.f32.partialorder %v59_v17, 0.0 }
 0x150   :  { %v115_v18 = vpop.eup %114 }
 0x151   :  { %v61_v19 = vmul.f32 %v115_v18, %v58_v15 }
 0x153   :  { %v63_v21 = vsel %vm62_vm1, %v58_v15, %v61_v19 }
 0x154   :  { %v117_v22 = vpop.eup %116  ;;  %v66_v23 = vsel %vm64_vm2, %v65_v20, %v63_v21 }
 0x155   :  { %v68_v24 = vmul.f32 %v117_v22, %v59_v17  ;;  %v79_v25 = vadd.f32 1e-06, %v66_v23 }
 0x157   :  { %v70_v27 = vsel %vm69_vm3, %v59_v17, %v68_v24  ;;  %118 = vrcp.f32 %v79_v25 }
 0x158   :  { %v73_v28 = vsel %vm71_vm4, %v72_v26, %v70_v27 }
 0x159   :  { %v80_v29 = vadd.f32 1e-06, %v73_v28 }
 0x15b   :  { %120 = vrcp.f32 %v80_v29 }
 0x161   :  { %v119_v32 = vpop.eup %118 }
 0x162   :  { %v82_v34 = vmul.f32 %v119_v32, %v77_v31 }
 0x164   :  { %v86_v36 = vadd.f32 %v85_v33, %v82_v34 }
 0x165   :  { %v121_v37 = vpop.eup %120 }
 0x166   :  { %v84_v38 = vmul.f32 %v121_v37, %v78_v35  ;;  %88 = vst.msk [vmem:[#allocation7] sm:$0xff] %vm39_vm0, %v86_v36 }
 0x168   :  { %v87_v39 = vadd.f32 %v85_v33, %v84_v38 }
 0x16a   :  { %89 = vst.msk [vmem:[#allocation7 + $0x8] sm:$0xff] %vm39_vm0, %v87_v39 }
 0x16b   :  { %165 = shalt.err (!%p162_p1)
}
 0x16c   :  { %s166_s10 = scalar_lea.hbm %s252_s2, 256 }
 0x16d   :  { %p167_p2 = scmp.ne.s32.totalorder %s252_s2, %s166_s10  ;;  %p170_p3 = scmp.lt.u32.totalorder %s166_s10, %s252_s2 }
 0x16f   :  { %p172_p4 = pnand %p170_p3, %p167_p2 }
 0x171   :  { %175 = shalt.err (!%p172_p4)
}
 0x172   :  { %101 = dma.vmem_to_hbm [thread:$0]  %s96_s6, 256, %s252_s2, [#allocation4], %s184_s0, %s184_s0, %s185_s29  }
 0x173   :  { %180 = dma.done.wait [#allocation4], 256  }
 0x174   :  { %181 = vsyncadd [#allocation4], 4294967040 }
 0x175   :  { %105 = vsyncpa [#allocation3], 1 }
 0x176   :  { %106 = vsyncpa [#allocation4], 1 }
 0x177   :  { %107 = vsyncpa [#allocation5], 1 }

</bundles_post_ra>
